<compile_context>
chip_gen: v7x
topology: tpu7x:2x2x1
jax: 0.10.0
libtpu: 0.0.40
codegen_flags: <defaults>
</compile_context>

<pallas_src>
import functools

import jax
import jax.numpy as jnp
from jax.experimental import pallas as pl
from jax.experimental.pallas import tpu as pltpu


_FAST_PATH_F32_BYTES = 1 * 1024 * 1024  # whole-array path if f32-equiv input <= 1 MiB


def _mean_pool_single_kernel(x_ref, o_ref, *, inv_t):
    # Whole array resident in VMEM; single invocation.
    o_ref[...] = (jnp.sum(x_ref[...], axis=1, dtype=jnp.float32) * inv_t).astype(o_ref.dtype)


def _mean_pool_kernel(x_ref, o_ref, acc_ref, *, inv_t, t_block, t_rem):
    # Grid: (batch blocks, hidden blocks, sequence blocks); reduction axis last.
    # x_ref:   (bb, tt, dd) input tile in VMEM
    # o_ref:   (bb, dd)     output tile (resident across the T axis)
    # acc_ref: (bb, dd)     f32 scratch accumulator
    t = pl.program_id(2)
    n_t = pl.num_programs(2)

    @pl.when(t == 0)
    def _init():
        acc_ref[...] = jnp.zeros_like(acc_ref)

    if t_rem == 0:
        acc_ref[...] += jnp.sum(x_ref[...], axis=1, dtype=jnp.float32)
    else:
        # Last T chunk is partial: padded rows of a partial input block are
        # unspecified, so mask them out before accumulating.
        n_valid = jnp.where(t == n_t - 1, t_rem, t_block)
        row = jax.lax.broadcasted_iota(jnp.int32, x_ref.shape, 1)
        xv = jnp.where(row < n_valid, x_ref[...], jnp.zeros((), x_ref.dtype))
        acc_ref[...] += jnp.sum(xv, axis=1, dtype=jnp.float32)

    @pl.when(t == n_t - 1)
    def _finalize():
        o_ref[...] = (acc_ref[...] * inv_t).astype(o_ref.dtype)


def _vmem_capacity_bytes() -> int:
    """Physical VMEM of the attached TPU; conservative 64 MiB if unknown."""
    try:
        info = pltpu.get_tpu_info()
        cap = getattr(info, "vmem_capacity_bytes", None)
        if cap:
            return int(cap)
    except Exception:
        pass
    return 64 * 1024 * 1024


def _plan_tiles(B, T, D, itemsize, max_bytes_per_buffer=None):
    """Pick (bb, tt, dd, vmem_limit_bytes) for the tiled reduction."""
    vmem_cap = _vmem_capacity_bytes()
    small_vmem = vmem_cap <= 64 * 1024 * 1024  # v7x-class part (64 MiB, 2 TCs/chip)
    if small_vmem:
        per_buf_cap = 6 * 1024 * 1024
        vmem_limit = 48 * 1024 * 1024
    else:
        per_buf_cap = 12 * 1024 * 1024
        vmem_limit = 64 * 1024 * 1024
    if max_bytes_per_buffer is not None:
        per_buf_cap = max_bytes_per_buffer
    # HBM-roofline plateau: growing a tile past a few MiB buys essentially nothing.
    per_buf_target = min(4 * 1024 * 1024, per_buf_cap)

    # Sublane-dense batch block (output sublane dim must be a multiple of 8 or full B).
    b_step = 16 if itemsize == 2 else 8
    bb = B if B < 8 else (b_step if B >= b_step else 8)
    tt_min = T if T < 8 else 8

    # Lane-dense hidden block; shrink only if even the minimal tile is too big.
    dd = D
    if D % 128 == 0 and bb * tt_min * D * itemsize > per_buf_cap:
        dd = max(128, (per_buf_cap // (bb * tt_min * itemsize)) // 128 * 128)
    # TODO(synk): if D is not a multiple of 128 AND bb*8*D*itemsize exceeds the
    # VMEM budget (pathologically large ragged D), dd stays at full D.

    # Sequence block: whole sequence if it fits, else largest 8-multiple under
    # the per-buffer cap (tail chunk masked in-kernel).
    if T <= 8 or bb * T * dd * itemsize <= per_buf_cap:
        tt = T
    else:
        tt = max(8, (per_buf_cap // max(1, bb * dd * itemsize)) // 8 * 8)
        tt = min(tt, (T // 8) * 8)

    # Grow the batch block toward the roofline plateau when the whole sequence
    # already fits in one chunk (short-T / small-D shapes).
    if tt == T:
        while bb < B and (bb + b_step) * T * dd * itemsize <= per_buf_target:
            bb += b_step
        bb = min(bb, B)

    # Give a second TensorCore parallel work if the batch axis collapsed to a
    # single block: split D into >=2 lane-dense blocks (neutral on 1-TC parts).
    grid_b = pl.cdiv(B, bb)
    grid_d = pl.cdiv(D, dd)
    if small_vmem and grid_b * grid_d < 2 and D % 128 == 0 and D >= 256:
        dd = ((D // 2 + 127) // 128) * 128

    return bb, tt, dd, vmem_limit


def mean_pool(x: jax.Array, *, max_bytes_per_buffer=None):
    """Pallas equivalent of MeanPool.forward: returns (x.mean(axis=1), None)."""
    B, T, D = x.shape
    itemsize = jnp.dtype(x.dtype).itemsize
    inv_t = 1.0 / float(T)

    # Fast path: tiny inputs as one whole-array invocation (no grid/pipeline).
    if max_bytes_per_buffer is None and B * T * D * 4 <= _FAST_PATH_F32_BYTES:
        out = pl.pallas_call(
            functools.partial(_mean_pool_single_kernel, inv_t=inv_t),
            out_shape=jax.ShapeDtypeStruct((B, D), x.dtype),
            in_specs=[pl.BlockSpec((B, T, D), lambda: (0, 0, 0))],
            out_specs=pl.BlockSpec((B, D), lambda: (0, 0)),
        )(x)
        return out, None

    bb, tt, dd, vmem_limit = _plan_tiles(B, T, D, itemsize, max_bytes_per_buffer)
    grid = (pl.cdiv(B, bb), pl.cdiv(D, dd), pl.cdiv(T, tt))
    t_rem = T % tt

    kernel = functools.partial(_mean_pool_kernel, inv_t=inv_t, t_block=tt, t_rem=t_rem)

    out = pl.pallas_call(
        kernel,
        out_shape=jax.ShapeDtypeStruct((B, D), x.dtype),
        grid_spec=pltpu.PrefetchScalarGridSpec(
            num_scalar_prefetch=0,
            grid=grid,
            in_specs=[pl.BlockSpec((bb, tt, dd), lambda b, d, t: (b, t, d))],
            out_specs=pl.BlockSpec((bb, dd), lambda b, d, t: (b, d)),
            scratch_shapes=[pltpu.VMEM((bb, dd), jnp.float32)],
        ),
        compiler_params=pltpu.CompilerParams(
            # Batch / hidden blocks are independent (megacore-shardable on a
            # 2-TC part); the T reduction axis is the accumulator axis (last).
            dimension_semantics=("parallel", "parallel", "arbitrary"),
            # Generation-aware scoped VMEM limit; double-buffered tiles stay
            # well under it for all planned tile sizes.
            vmem_limit_bytes=vmem_limit,
        ),
    )(x)
    return out, None


def _check(x, atol, rtol, **kwargs):
    pooled, none_out = mean_pool(x, **kwargs)
    pooled = jax.block_until_ready(pooled)
    ref = jnp.mean(x.astype(jnp.float32), axis=1).astype(x.dtype)
    assert none_out is None
    assert pooled.shape == (x.shape[0], x.shape[2])
    assert jnp.allclose(pooled.astype(jnp.float32), ref.astype(jnp.float32),
                        atol=atol, rtol=rtol), (x.shape, x.dtype)


if __name__ == "__main__":
    key = jax.random.PRNGKey(0)
    k = jax.random.split(key, 5)

    # 1) Small shape consistent with the module's (batch, seq, hidden) input
    #    -> single-block fast path.
    _check(jax.random.normal(k[0], (2, 8, 128), dtype=jnp.float32), 1e-5, 1e-5)

    # 2) Just past the fast-path threshold -> tiled path (auto plan).
    _check(jax.random.normal(k[1], (8, 136, 256), dtype=jnp.float32), 1e-5, 1e-5)

    # 3) bf16 input: f32 accumulation inside the kernel, cast back on store.
    _check(jax.random.normal(k[2], (16, 32, 128)).astype(jnp.bfloat16), 2e-2, 2e-2)

    # 4) Ragged T (not a multiple of 8) with a tiny buffer cap -> multi-step
    #    T reduction with the masked tail chunk.
    _check(jax.random.normal(k[3], (8, 100, 128), dtype=jnp.float32), 1e-5, 1e-5,
           max_bytes_per_buffer=64 * 1024)

    # 5) Ragged B (not a multiple of 8) + split D + multi-step T -> 3-axis grid
    #    with a partial (masked-store) batch block.
    _check(jax.random.normal(k[4], (10, 40, 256), dtype=jnp.float32), 1e-5, 1e-5,
           max_bytes_per_buffer=32 * 1024)

    print("KERNEL_OK")
</pallas_src>

<mosaic_0001>
module attributes {stable_mosaic.version = 11 : i64} {
  func.func @_mean_pool_single_kernel(%arg0: memref<2x8x128xf32, #tpu.memory_space<vmem>>, %arg1: memref<2x128xf32, #tpu.memory_space<vmem>>) attributes {dimension_semantics = [], scalar_prefetch = 0 : i64, scratch_operands = 0 : i64, tpu.core_type = #tpu.core_type<tc>} {
    %c0 = arith.constant 0 : index
    %c0_0 = arith.constant 0 : index
    %c0_1 = arith.constant 0 : index
    %0 = vector.load %arg0[%c0, %c0_0, %c0_1] : memref<2x8x128xf32, #tpu.memory_space<vmem>>, vector<2x8x128xf32>
    %cst = arith.constant dense<0.000000e+00> : vector<2x128xf32>
    %1 = vector.multi_reduction <add>, %0, %cst [1] : vector<2x8x128xf32> to vector<2x128xf32>
    %cst_2 = arith.constant 1.250000e-01 : f32
    %2 = vector.broadcast %cst_2 : f32 to vector<2x128xf32>
    %3 = arith.mulf %1, %2 : vector<2x128xf32>
    %c0_3 = arith.constant 0 : index
    %c0_4 = arith.constant 0 : index
    %4 = vector.load %arg1[%c0_3, %c0_4] : memref<2x128xf32, #tpu.memory_space<vmem>>, vector<2x128xf32>
    tpu.vector_store %arg1[%c0_3, %c0_4], %3 {strides = array<i32>} : memref<2x128xf32, #tpu.memory_space<vmem>>, vector<2x128xf32>,
    return
  }
}

</mosaic_0001>

<bundles_post_ra>
// kernel: tpu_custom_call.1
= control target key start
LH: loop header
LB: loop body
LE: loop exit
PB: predicated region body
PF: predicated region fallthrough
CT: control target
= control target key end

     0   :  { %6 = vsyncpa [#allocation3], 0  ;;  %s150_s0 = inlined_call_operand.hbm [shape: f32[2,8,128], index: 0, kind: input, shape index: {}]   ;;  %s151_s1 = inlined_call_operand.hbm [shape: f32[2,128], index: 1, kind: output, shape index: {}]  }
   0x1   :  { %7 = vsyncpa [#allocation4], 0  ;;  %s112_s6 = smov [#allocation2]   ;;  %s64_s10 = scalar_lea.hbm %s150_s0, 256 }
   0x2   :  { %s13_s7 = sshll.u32 %s112_s6, 4  ;;  %p65_p0 = scmp.ne.s32.totalorder %s150_s0, %s64_s10  ;;  %s14_s7 = int_to_ptr.vmem [resolvable:$true] %s13_s7 }
   0x3   :  { %p68_p1 = scmp.lt.u32.totalorder %s64_s10, %s150_s0 }
   0x5   :  { %p70_p2 = pnand %p68_p1, %p65_p0 }
   0x7   :  { %73 = shalt.err (!%p70_p2)
}
   0x8   :  { %s74_s15 = scalar_lea.vmem %s14_s7, 256  ;;  %p79_p4 = scmp.lt.s32.totalorder %s14_s7, %s14_s7 }
   0x9   :  { %p75_p3 = scmp.ne.s32.totalorder %s14_s7, %s74_s15  ;;  %p80_p5 = scmp.lt.s32.totalorder %s74_s15, %s74_s15 }
   0xb   :  { %p81_p6 = por %p80_p5, %p79_p4 }
   0xd   :  { %p82_p7 = pnand %p81_p6, %p75_p3 }
   0xf   :  { %85 = shalt.err (!%p82_p7)
}
  0x10   :  { %s113_s16 = smov 128   ;;  %s114_s17 = smov 8  }
  0x11   :  { %19 = dma.hbm_to_vmem [thread:$0]  %s150_s0, 256, %s14_s7, [#allocation3], %s113_s16, %s113_s16, %s114_s17  }
  0x12   :  { %108 = dma.done.wait [#allocation3], 256  }
  0x13   :  { %109 = vsyncadd [#allocation3], 4294967040  ;;  %v23_v0 = vld [vmem:[#allocation2] sm:$0xff]  ;;  %v24_v1 = vld [vmem:[#allocation2 + $0x8] sm:$0xff]  ;;  %s115_s20 = smov [#allocation5]   ;;  %vm41_vm0 = vcmask 1041409  }
  0x14   :  { %v25_v2 = vrot.slane %v23_v0, 4  ;;  %v31_v3 = vrot.slane %v24_v1, 4  ;;  %s51_s21 = sshll.u32 %s115_s20, 4  ;;  %s52_s21 = int_to_ptr.vmem [resolvable:$true] %s51_s21 }
  0x15   :  { %s86_s0 = scalar_lea.vmem %s52_s21, 32  ;;  %p91_p9 = scmp.lt.s32.totalorder %s52_s21, %s52_s21 }
  0x16   :  { %v26_v4 = vadd.f32 %v25_v2, %v23_v0  ;;  %v32_v5 = vadd.f32 %v31_v3, %v24_v1  ;;  %p87_p8 = scmp.ne.s32.totalorder %s52_s21, %s86_s0  ;;  %p92_p10 = scmp.lt.s32.totalorder %s86_s0, %s86_s0 }
  0x18   :  { %v27_v6 = vrot.slane %v26_v4, 2  ;;  %v33_v7 = vrot.slane %v32_v5, 2  ;;  %p93_p11 = por %p92_p10, %p91_p9 }
  0x1a   :  { %v28_v8 = vadd.f32 %v27_v6, %v26_v4  ;;  %v34_v9 = vadd.f32 %v33_v7, %v32_v5  ;;  %p94_p12 = pnand %p93_p11, %p87_p8 }
  0x1c   :  { %v29_v10 = vrot.slane %v28_v8, 1  ;;  %v35_v11 = vrot.slane %v34_v9, 1 }
  0x1e   :  { %v30_v12 = vadd.f32 %v29_v10, %v28_v8  ;;  %v36_v13 = vadd.f32 %v35_v11, %v34_v9 }
  0x20   :  { %v37_v14 = vmul.f32 0.125, %v30_v12  ;;  %v38_v15 = vmul.f32 0.125, %v36_v13 }
  0x22   :  { %v42_v16 = vsel %vm41_vm0, %v38_v15, %v37_v14 }
  0x23   :  { %44 = vst [vmem:[#allocation5] sm:$0x3] %v42_v16 }
  0x24   :  { %97 = shalt.err (!%p94_p12)
}
  0x25   :  { %s98_s24 = scalar_lea.hbm %s151_s1, 32 }
  0x26   :  { %p99_p13 = scmp.ne.s32.totalorder %s151_s1, %s98_s24  ;;  %p102_p0 = scmp.lt.u32.totalorder %s98_s24, %s151_s1 }
  0x28   :  { %p104_p1 = pnand %p102_p0, %p99_p13 }
  0x2a   :  { %107 = shalt.err (!%p104_p1)
}
  0x2b   :  { %54 = dma.vmem_to_hbm [thread:$0]  %s52_s21, 32, %s151_s1, [#allocation4]  }
  0x2c   :  { %110 = dma.done.wait [#allocation4], 32  }
  0x2d   :  { %111 = vsyncadd [#allocation4], 4294967264 }
  0x2e   :  { %58 = vsyncpa [#allocation3], 1 }
  0x2f   :  { %59 = vsyncpa [#allocation4], 1 }

</bundles_post_ra>
